<compile_context>
chip_gen: v7x
topology: tpu7x:2x2x1
jax: 0.10.0
libtpu: 0.0.40
codegen_flags: <defaults>
</compile_context>

<pallas_src>
import jax
import jax.numpy as jnp
from jax.experimental import pallas as pl
from jax.experimental.pallas import tpu as pltpu


_VMEM_BUDGET = 24 * 1024 * 1024  # double-buffered working set target (bytes)


def _round_up(n: int, m: int) -> int:
    return ((n + m - 1) // m) * m


def _select_tiles(B, L_pad, H, itemsize):
    """Pick (tm, tn) under the VMEM budget; dtype-aware sublane rounding."""
    sub = {4: 8, 2: 16, 1: 32}.get(itemsize, 8)
    tm = min(512, _round_up(B, sub))

    def vmem_est(tm_, tn_):
        # double-buffered x, w, out tiles + f32 bias tile
        return 2 * ((tm_ * H + H * tn_ + tm_ * tn_) * itemsize + tn_ * 4)

    # Largest lane-multiple label tile dividing L_pad that fits the budget.
    tn = 128
    for cand in (1024, 512, 256, 128):
        if L_pad % cand == 0 and vmem_est(tm, cand) <= _VMEM_BUDGET:
            tn = cand
            break
    # v7x megacore: keep >= 2 label blocks when possible so both TCs get work.
    while L_pad // tn < 2 and tn > 128:
        tn //= 2
    # Very wide H in f32 could still blow the budget: shrink the batch tile.
    while vmem_est(tm, tn) > _VMEM_BUDGET and tm > sub:
        tm = max(sub, _round_up(tm // 2, sub))
    return tm, tn, vmem_est(tm, tn)


def _linear_kernel(x_ref, w_ref, b_ref, o_ref):
    # x_ref: [tm, H], w_ref: [H, tn] (pre-transposed), b_ref: [1, tn] f32
    # y = x @ W_t + b; f32 accumulation on the MXU, no in-kernel transpose.
    acc = jnp.dot(x_ref[...], w_ref[...], preferred_element_type=jnp.float32)
    o_ref[...] = (acc + b_ref[...]).astype(o_ref.dtype)


def prepare_head_params(weight, bias):
    """One-time (model-load) prep of the logits-head parameters.

    weight: [L, H] PyTorch Linear weight (out, in)
    bias:   [L]
    returns (w_t [H, L_pad], bias2d [1, L_pad] f32, L)
    Pads the label axis to a lane multiple and transposes to NN layout ONCE,
    so the per-call forward never touches the full weight outside the kernel.
    """
    L, H = weight.shape
    L_pad = _round_up(L, 128)
    if L_pad != L:
        weight = jnp.pad(weight, ((0, L_pad - L), (0, 0)))
        bias = jnp.pad(bias, ((0, L_pad - L),))
    w_t = jnp.asarray(weight).T                       # [H, L_pad]
    b2d = jnp.asarray(bias).reshape(1, L_pad).astype(jnp.float32)
    return w_t, b2d, L


def cnn_cutted_forward(x, w_t, b2d, num_labels=None):
    """Forward of CNNPlusStructured_cutted (logits head).

    x:    [B, H]       features entering the 4th-from-last layer
    w_t:  [H, L_pad]   pre-transposed, pre-padded weight (prepare_head_params)
    b2d:  [1, L_pad]   pre-padded f32 bias
    returns [B, num_labels]
    """
    B, H = x.shape
    Hw, L_pad = w_t.shape
    assert H == Hw, "feature dim mismatch"
    L = L_pad if num_labels is None else num_labels

    itemsize = jnp.dtype(x.dtype).itemsize
    tm, tn, est_vmem = _select_tiles(B, L_pad, H, itemsize)
    B_pad = _round_up(B, tm)
    if B_pad != B:
        x = jnp.pad(x, ((0, B_pad - B), (0, 0)))

    # Weight-stationary grid: label axis OUTER, batch axis INNER, so the
    # (H, tn) weight tile / (1, tn) bias tile block indices are constant
    # across the inner axis and are fetched only once per label block.
    grid = (L_pad // tn, B_pad // tm)

    cp_kwargs = dict(dimension_semantics=("parallel", "parallel"))
    if est_vmem > (12 << 20):
        cp_kwargs["vmem_limit_bytes"] = min(max(int(est_vmem * 1.5), 32 << 20),
                                            64 << 20)

    cost = pl.CostEstimate(
        flops=2 * B_pad * H * L_pad,
        transcendentals=0,
        bytes_accessed=(B_pad * H + H * L_pad + B_pad * L_pad) * itemsize
                        + L_pad * 4,
    )

    out = pl.pallas_call(
        _linear_kernel,
        out_shape=jax.ShapeDtypeStruct((B_pad, L_pad), x.dtype),
        grid_spec=pltpu.PrefetchScalarGridSpec(
            num_scalar_prefetch=0,
            grid=grid,
            in_specs=[
                pl.BlockSpec((tm, H), lambda j, i: (i, 0)),   # activations
                pl.BlockSpec((H, tn), lambda j, i: (0, j)),   # weight [H, L]
                pl.BlockSpec((1, tn), lambda j, i: (0, j)),   # bias (f32)
            ],
            out_specs=pl.BlockSpec((tm, tn), lambda j, i: (i, j)),
        ),
        compiler_params=pltpu.CompilerParams(**cp_kwargs),
        cost_estimate=cost,
    )(x, w_t, b2d)

    # Consumers that can handle padded logits may skip this slice entirely.
    if B_pad != B or L_pad != L:
        out = out[:B, :L]
    return out


if __name__ == "__main__":
    # TODO(synk): the original forward returns an *uninitialized* `logit` when
    # all_layers[-4] is not in self.layers (a PyTorch runtime error); that
    # branch has no kernel equivalent and is not modeled here.

    key = jax.random.PRNGKey(0)
    kx, kw, kb, kx2, kw2, kb2 = jax.random.split(key, 6)

    # --- small shapes consistent with the module: [batch, hidden] -> [batch, labels]
    batch, hidden, num_labels = 8, 32, 4
    x = jax.random.normal(kx, (batch, hidden), dtype=jnp.float32)
    weight = jax.random.normal(kw, (num_labels, hidden), dtype=jnp.float32) * 0.02
    bias = jax.random.normal(kb, (num_labels,), dtype=jnp.float32) * 0.02

    w_t, b2d, L = prepare_head_params(weight, bias)     # one-time prep
    out = jax.block_until_ready(cnn_cutted_forward(x, w_t, b2d, L))
    ref = x @ weight.T + bias
    assert out.shape == (batch, num_labels)
    assert jnp.allclose(out, ref, atol=1e-5, rtol=1e-5)

    # --- a production-like bf16 head to exercise the weight-stationary grid
    B2, H2, L2 = 256, 768, 1000
    x2 = jax.random.normal(kx2, (B2, H2), dtype=jnp.float32).astype(jnp.bfloat16)
    w2 = (jax.random.normal(kw2, (L2, H2), dtype=jnp.float32) * 0.02).astype(jnp.bfloat16)
    b2 = (jax.random.normal(kb2, (L2,), dtype=jnp.float32) * 0.02).astype(jnp.bfloat16)

    w2_t, b2_2d, L2_ = prepare_head_params(w2, b2)      # one-time prep
    out2 = jax.block_until_ready(cnn_cutted_forward(x2, w2_t, b2_2d, L2_))
    ref2 = (x2.astype(jnp.float32) @ w2.astype(jnp.float32).T
            + b2.astype(jnp.float32))
    assert out2.shape == (B2, L2)
    assert jnp.allclose(out2.astype(jnp.float32), ref2, atol=2e-2, rtol=2e-2)

    print("KERNEL_OK")
</pallas_src>

<mosaic_0001>
module attributes {stable_mosaic.version = 11 : i64} {
  func.func @_linear_kernel(%arg0: i32, %arg1: i32, %arg2: memref<8x32xf32, #tpu.memory_space<vmem>>, %arg3: memref<32x128xf32, #tpu.memory_space<vmem>>, %arg4: memref<1x128xf32, #tpu.memory_space<vmem>>, %arg5: memref<8x128xf32, #tpu.memory_space<vmem>>) attributes {dimension_semantics = [#tpu.dimension_semantics<parallel>, #tpu.dimension_semantics<parallel>], iteration_bounds = array<i64: 1, 1>, scalar_prefetch = 0 : i64, scratch_operands = 0 : i64, tpu.core_type = #tpu.core_type<tc>, window_params = [{transform_indices = @transform_0, window_bounds = array<i64: 8, 32>}, {transform_indices = @transform_1, window_bounds = array<i64: 32, 128>}, {transform_indices = @transform_2, window_bounds = array<i64: 1, 128>}, {transform_indices = @transform_3, window_bounds = array<i64: 8, 128>}]} {
    %c0 = arith.constant 0 : index
    %c0_0 = arith.constant 0 : index
    %0 = vector.load %arg2[%c0, %c0_0] : memref<8x32xf32, #tpu.memory_space<vmem>>, vector<8x32xf32>
    %c0_1 = arith.constant 0 : index
    %c0_2 = arith.constant 0 : index
    %1 = vector.load %arg3[%c0_1, %c0_2] : memref<32x128xf32, #tpu.memory_space<vmem>>, vector<32x128xf32>
    %cst = arith.constant dense<0.000000e+00> : vector<8x128xf32>
    %2 = tpu.matmul %0, %1, %cst {dimension_numbers = #tpu.dot_dimension_numbers<[1], [0], [0], [1], [0, 0, 1, 1], [], []>} : vector<8x32xf32>, vector<32x128xf32>, vector<8x128xf32> -> vector<8x128xf32>
    %c0_3 = arith.constant 0 : index
    %c0_4 = arith.constant 0 : index
    %3 = vector.load %arg4[%c0_3, %c0_4] : memref<1x128xf32, #tpu.memory_space<vmem>>, vector<1x128xf32>
    %4 = vector.broadcast %3 : vector<1x128xf32> to vector<8x128xf32>
    %5 = arith.addf %2, %4 : vector<8x128xf32>
    %c0_5 = arith.constant 0 : index
    %c0_6 = arith.constant 0 : index
    %6 = vector.load %arg5[%c0_5, %c0_6] : memref<8x128xf32, #tpu.memory_space<vmem>>, vector<8x128xf32>
    tpu.vector_store %arg5[%c0_5, %c0_6], %5 {strides = array<i32>} : memref<8x128xf32, #tpu.memory_space<vmem>>, vector<8x128xf32>,
    return
  }
  func.func @transform_0(%arg0: i32, %arg1: i32) -> (i32, i32) {
    %c0_i32 = arith.constant 0 : i32
    %c0_i32_0 = arith.constant 0 : i32
    return %arg1, %c0_i32 : i32, i32
  }
  func.func @transform_1(%arg0: i32, %arg1: i32) -> (i32, i32) {
    %c0_i32 = arith.constant 0 : i32
    %c0_i32_0 = arith.constant 0 : i32
    return %c0_i32, %arg0 : i32, i32
  }
  func.func @transform_2(%arg0: i32, %arg1: i32) -> (i32, i32) {
    %c0_i32 = arith.constant 0 : i32
    %c0_i32_0 = arith.constant 0 : i32
    return %c0_i32, %arg0 : i32, i32
  }
  func.func @transform_3(%arg0: i32, %arg1: i32) -> (i32, i32) {
    %c0_i32 = arith.constant 0 : i32
    return %arg1, %arg0 : i32, i32
  }
}

</mosaic_0001>

<bundles_post_ra>
// kernel: tpu_custom_call.1
= control target key start
LH: loop header
LB: loop body
LE: loop exit
PB: predicated region body
PF: predicated region fallthrough
CT: control target
= control target key end

     0   :  { %8 = vsyncpa [#allocation3], 0  ;;  %s322_s0 = inlined_call_operand.hbm [shape: f32[8,32], index: 0, kind: input, shape index: {}]   ;;  %s323_s1 = inlined_call_operand.hbm [shape: f32[32,128], index: 1, kind: input, shape index: {}]   ;;  %s324_s2 = inlined_call_operand.vmem [shape: f32[1,128], index: 2, kind: input, shape index: {}]   ;;  %s325_s3 = inlined_call_operand.hbm [shape: f32[8,128], index: 3, kind: output, shape index: {}]  }
   0x1   :  { %9 = vsyncpa [#allocation6], 0 }
   0x2   :  { %10 = vsyncpa [#allocation4], 0  ;;  %s248_s12 = smov [#allocation2]   ;;  %s249_s14 = smov [#allocation5]  }
   0x3   :  { %s17_s13 = sshll.u32 %s248_s12, 4  ;;  %s26_s15 = sshll.u32 %s249_s14, 4  ;;  %s18_s13 = int_to_ptr.vmem [resolvable:$true] %s17_s13  ;;  %s276_s15 = int_to_ptr.vmem [resolvable:$true] %s26_s15 }
   0x4   :  { %s176_s18 = scalar_lea.hbm %s322_s0, 128 }
   0x5   :  { %p177_p0 = scmp.ne.s32.totalorder %s322_s0, %s176_s18  ;;  %p180_p1 = scmp.lt.u32.totalorder %s176_s18, %s322_s0 }
   0x7   :  { %p182_p2 = pnand %p180_p1, %p177_p0 }
   0x9   :  { %185 = shalt.err (!%p182_p2)
}
   0xa   :  { %s186_s23 = scalar_lea.vmem %s18_s13, 128  ;;  %p191_p4 = scmp.lt.s32.totalorder %s18_s13, %s18_s13 }
   0xb   :  { %p187_p3 = scmp.ne.s32.totalorder %s18_s13, %s186_s23  ;;  %p192_p5 = scmp.lt.s32.totalorder %s186_s23, %s186_s23 }
   0xd   :  { %p193_p6 = por %p192_p5, %p191_p4 }
   0xf   :  { %p194_p7 = pnand %p193_p6, %p187_p3 }
  0x11   :  { %197 = shalt.err (!%p194_p7)
}
  0x12   :  { %20 = dma.hbm_to_vmem [thread:$0]  %s322_s0, 128, %s18_s13, [#allocation3]  }
  0x13   :  { %s198_s28 = scalar_lea.hbm %s323_s1, 512 }
  0x14   :  { %p199_p8 = scmp.ne.s32.totalorder %s323_s1, %s198_s28  ;;  %p202_p9 = scmp.lt.u32.totalorder %s198_s28, %s323_s1 }
  0x16   :  { %p204_p10 = pnand %p202_p9, %p199_p8 }
  0x18   :  { %207 = shalt.err (!%p204_p10)
}
  0x19   :  { %s208_s6 = scalar_lea.vmem %s276_s15, 512  ;;  %p213_p12 = scmp.lt.s32.totalorder %s276_s15, %s276_s15 }
  0x1a   :  { %p209_p11 = scmp.ne.s32.totalorder %s276_s15, %s208_s6  ;;  %p214_p13 = scmp.lt.s32.totalorder %s208_s6, %s208_s6 }
  0x1c   :  { %p215_p0 = por %p214_p13, %p213_p12 }
  0x1e   :  { %p216_p1 = pnand %p215_p0, %p209_p11 }
  0x20   :  { %219 = shalt.err (!%p216_p1)
}
  0x21   :  { %s250_s0 = smov 128   ;;  %s251_s7 = smov 8  }
  0x22   :  { %32 = dma.hbm_to_vmem [thread:$0]  %s323_s1, 512, %s276_s15, [#allocation6], %s250_s0, %s250_s0, %s251_s7  }
  0x23   :  { %242 = dma.done.wait [#allocation3], 128  }
  0x24   :  { %243 = vsyncadd [#allocation3], 4294967168 }
  0x25   :  { %244 = dma.done.wait [#allocation6], 512  }
  0x26   :  { %245 = vsyncadd [#allocation6], 4294966784  ;;  %v252_v0 = vmov 0.0|0.0   ;;  %vm253_vm0 = vmmov 0   ;;  %v254_v1 = vmov 0.0   ;;  %v42_v2 = vld [vmem:[#allocation5] sm:$0xff] }
  0x27   :  { %162 = vmatprep.subr.bf16.mxu0 %v252_v0  ;;  %159 = vmatprep.mubr.msk.f32.mxu0 %vm253_vm0, %v254_v1  ;;  %v43_v3 = vld [vmem:[#allocation5 + $0x8] sm:$0xff]  ;;  %v44_v4 = vld [vmem:[#allocation5 + $0x10] sm:$0xff]  ;;  %v45_v6 = vld [vmem:[#allocation5 + $0x18] sm:$0xff]  ;;  %vm53_vm1 = vcmask 261120   ;;  %s255_s11 = smov [#allocation7]  }
  0x28   :  { %v163_v5 = vpack.c.bf16 %v43_v3, %v42_v2  ;;  %v166_v7 = vpack.c.bf16 %v45_v6, %v44_v4  ;;  %v41_v8 = vld [vmem:[#allocation2] sm:$0xff]  ;;  %s134_s12 = sshll.u32 %s255_s11, 4  ;;  %s135_s12 = int_to_ptr.vmem [resolvable:$true] %s134_s12 }
  0x29   :  { %v144_v9 = vld [vmem:[%s324_s2] ss:$0 sm:$0xff]  ;;  %s220_s13 = scalar_lea.vmem %s135_s12, 128  ;;  %p225_p3 = scmp.lt.s32.totalorder %s135_s12, %s135_s12 }
  0x2a   :  { %164 = vmatpush3.bf16.msra.mxu0 %v163_v5  ;;  %p221_p2 = scmp.ne.s32.totalorder %s135_s12, %s220_s13  ;;  %p226_p4 = scmp.lt.s32.totalorder %s220_s13, %s220_s13 }
  0x2b   :  { %165 = vmatprep.subr.bf16.mxu0 %v252_v0 }
  0x2c   :  { %p227_p5 = por %p226_p4, %p225_p3 }
  0x2e   :  { %167 = vmatpush3.bf16.msra.mxu0 %v166_v7  ;;  %p228_p6 = pnand %p227_p5, %p221_p2 }
  0x31   :  { %160 = vmatmul.mubr.msk.f32.vlgmr.msra.gmra.mrb[0].mxu0 %vm53_vm1, %v41_v8 }
 0x104   :  { %v123_v10 = vpop.f32.mrb[0].mxu0 }
 0x105   :  { %v124_v11 = vadd.f32 %v144_v9, %v123_v10  ;;  %v161_v12 = vpop.f32.mrb[1].mxu0 }
 0x107   :  { %127 = vst [vmem:[#allocation7] sm:$0xff] %v124_v11 }
 0x108   :  { %231 = shalt.err (!%p228_p6)
}
 0x109   :  { %s232_s16 = scalar_lea.hbm %s325_s3, 128 }
 0x10a   :  { %p233_p7 = scmp.ne.s32.totalorder %s325_s3, %s232_s16  ;;  %p236_p8 = scmp.lt.u32.totalorder %s232_s16, %s325_s3 }
 0x10c   :  { %p238_p9 = pnand %p236_p8, %p233_p7 }
 0x10e   :  { %241 = shalt.err (!%p238_p9)
}
 0x10f   :  { %137 = dma.vmem_to_hbm [thread:$0]  %s135_s12, 128, %s325_s3, [#allocation4]  }
 0x110   :  { %246 = dma.done.wait [#allocation4], 128  }
 0x111   :  { %247 = vsyncadd [#allocation4], 4294967168 }
 0x112   :  { %141 = vsyncpa [#allocation3], 1 }
 0x113   :  { %142 = vsyncpa [#allocation6], 1 }
 0x114   :  { %143 = vsyncpa [#allocation4], 1 }

</bundles_post_ra>
